<compile_context>
chip_gen: v7x
topology: tpu7x:2x2x1
jax: 0.10.0
libtpu: 0.0.40
codegen_flags: <defaults>
</compile_context>

<pallas_src>
import numpy as np
import jax
import jax.numpy as jnp
from jax.experimental import pallas as pl
from jax.experimental.pallas import tpu as pltpu

# ---- synthetic "G matrix" dimensions (the real module reads G.csv) -------
A = 20           # number of style attributes (rows of pre_computedG)
R = 58           # number of rows in G.csv (columns of pre_computedG)
B = 8            # batch size for the example input (sublane-aligned)
R_PAD = 128      # lane-dense output width (>= R, multiple of 128)
SUBLANE = 8      # f32 sublane tile
SCALE_FACTOR = 1.0
# TODO(synk): the real module reads G.csv via pandas; here G is built
# deterministically in-script since file I/O is not allowed.


def build_parameters():
    """Build W1 (svd_visual_elements), W2 (svd_G) and the fused, padded weight."""
    key = jax.random.PRNGKey(42)
    # pre_computedG: (A, R)  (CSV[ATTRIBUTES] transposed, divided by scale)
    g = np.asarray(jax.random.normal(key, (A, R), dtype=jnp.float32),
                   dtype=np.float64) / SCALE_FACTOR
    u, s, _ = np.linalg.svd(g)                       # u: (A, A), s: (A,)
    svd = np.matmul(np.linalg.inv(np.diag(s)),
                    u[:, : s.shape[0]].transpose())  # W1: (K, A), K == A
    transformed_g = np.matmul(svd, g).transpose()    # W2: (R, K)

    # Fused weight: out = x @ W1.T @ W2.T = x @ (W2 @ W1).T
    w_fused = np.matmul(transformed_g, svd)          # (R, A)
    w_fused_t = w_fused.transpose().astype(np.float32)   # (A, R), pre-transposed
    # Zero-pad the output/lane dim to R_PAD for a lane-dense, unmasked store.
    w_fused_t_pad = np.zeros((A, R_PAD), dtype=np.float32)
    w_fused_t_pad[:, :R] = w_fused_t

    w1 = jnp.asarray(svd, dtype=jnp.float32)              # svd_visual_elements
    w2 = jnp.asarray(transformed_g, dtype=jnp.float32)    # svd_G
    wf = jnp.asarray(w_fused_t_pad)                        # fused (A, R_PAD)
    return w1, w2, wf


# -------------------------- Pallas kernel --------------------------------
def svd_g_kernel(x_ref, w_ref, o_ref):
    # x: (Bp, A), w: (A, R_PAD) already transposed/fused -> out: (Bp, R_PAD)
    # Single MXU matmul, f32 accumulation, full-lane (128-wide) unmasked store.
    o_ref[...] = jnp.dot(
        x_ref[...], w_ref[...], preferred_element_type=jnp.float32
    ).astype(o_ref.dtype)


def svd_g_forward(x, w_fused_t_pad, r_out=R):
    Bx, Ax = x.shape
    Aw, Rp = w_fused_t_pad.shape
    assert Ax == Aw

    # Pad batch up to a sublane multiple so the activation / output tiles are
    # (8, 128)-friendly; padding rows are discarded after the kernel.
    Bp = ((Bx + SUBLANE - 1) // SUBLANE) * SUBLANE
    x_in = x if Bp == Bx else jnp.pad(x, ((0, Bp - Bx), (0, 0)))

    out_pad = pl.pallas_call(
        svd_g_kernel,
        out_shape=jax.ShapeDtypeStruct((Bp, Rp), jnp.float32),
        # Problem is tiny -> single grid point, full-array blocks resident in
        # VMEM, no pipelining overhead.  (If batch ever grows, add a batch grid
        # axis with dimension_semantics=("parallel",) to shard across v7x TCs.)
        in_specs=[
            pl.BlockSpec((Bp, Ax), lambda: (0, 0),
                         memory_space=pltpu.MemorySpace.VMEM),
            pl.BlockSpec((Aw, Rp), lambda: (0, 0),
                         memory_space=pltpu.MemorySpace.VMEM),
        ],
        out_specs=pl.BlockSpec((Bp, Rp), lambda: (0, 0),
                               memory_space=pltpu.MemorySpace.VMEM),
        cost_estimate=pl.CostEstimate(
            flops=2 * Bp * Aw * Rp,
            transcendentals=0,
            bytes_accessed=4 * (Bp * Ax + Aw * Rp + Bp * Rp),
        ),
    )(x_in, w_fused_t_pad)

    # Slice the padded, lane-dense output back to the true shape.
    return out_pad[:Bx, :r_out]


# ----------------------------- driver -------------------------------------
if __name__ == "__main__":
    w1, w2, w_fused_pad = build_parameters()

    key = jax.random.PRNGKey(0)
    x = jax.random.normal(key, (B, A), dtype=jnp.float32)

    out = svd_g_forward(x, w_fused_pad, R)
    out = jax.block_until_ready(out)

    # pure-JAX reference (original two-step semantics) for sanity
    ref = jnp.dot(jnp.dot(x, w1.T), w2.T)
    assert out.shape == (B, R)
    assert jnp.allclose(out, ref, atol=1e-4, rtol=1e-4), "mismatch vs reference"

    print("KERNEL_OK")
</pallas_src>

<mosaic_0001>
module attributes {stable_mosaic.version = 11 : i64} {
  func.func @svd_g_kernel(%arg0: memref<8x20xf32, #tpu.memory_space<vmem>>, %arg1: memref<20x128xf32, #tpu.memory_space<vmem>>, %arg2: memref<8x128xf32, #tpu.memory_space<vmem>>) attributes {dimension_semantics = [], scalar_prefetch = 0 : i64, scratch_operands = 0 : i64, tpu.core_type = #tpu.core_type<tc>} {
    %c0 = arith.constant 0 : index
    %c0_0 = arith.constant 0 : index
    %0 = vector.load %arg0[%c0, %c0_0] : memref<8x20xf32, #tpu.memory_space<vmem>>, vector<8x20xf32>
    %c0_1 = arith.constant 0 : index
    %c0_2 = arith.constant 0 : index
    %1 = vector.load %arg1[%c0_1, %c0_2] : memref<20x128xf32, #tpu.memory_space<vmem>>, vector<20x128xf32>
    %cst = arith.constant dense<0.000000e+00> : vector<8x128xf32>
    %2 = tpu.matmul %0, %1, %cst {dimension_numbers = #tpu.dot_dimension_numbers<[1], [0], [0], [1], [0, 0, 1, 1], [], []>} : vector<8x20xf32>, vector<20x128xf32>, vector<8x128xf32> -> vector<8x128xf32>
    %c0_3 = arith.constant 0 : index
    %c0_4 = arith.constant 0 : index
    %3 = vector.load %arg2[%c0_3, %c0_4] : memref<8x128xf32, #tpu.memory_space<vmem>>, vector<8x128xf32>
    tpu.vector_store %arg2[%c0_3, %c0_4], %2 {strides = array<i32>} : memref<8x128xf32, #tpu.memory_space<vmem>>, vector<8x128xf32>,
    return
  }
}

</mosaic_0001>

<bundles_post_ra>
// kernel: tpu_custom_call.1
= control target key start
LH: loop header
LB: loop body
LE: loop exit
PB: predicated region body
PF: predicated region fallthrough
CT: control target
= control target key end

     0   :  { %7 = vsyncpa [#allocation3], 0  ;;  %s301_s0 = inlined_call_operand.hbm [shape: f32[8,20], index: 0, kind: input, shape index: {}]   ;;  %s302_s1 = inlined_call_operand.hbm [shape: f32[20,128], index: 1, kind: input, shape index: {}]   ;;  %s303_s2 = inlined_call_operand.hbm [shape: f32[8,128], index: 2, kind: output, shape index: {}]  }
   0x1   :  { %8 = vsyncpa [#allocation6], 0 }
   0x2   :  { %9 = vsyncpa [#allocation4], 0  ;;  %s235_s9 = smov [#allocation2]   ;;  %s236_s11 = smov [#allocation5]  }
   0x3   :  { %s16_s10 = sshll.u32 %s235_s9, 4  ;;  %s25_s12 = sshll.u32 %s236_s11, 4  ;;  %s17_s10 = int_to_ptr.vmem [resolvable:$true] %s16_s10  ;;  %s258_s12 = int_to_ptr.vmem [resolvable:$true] %s25_s12 }
   0x4   :  { %s163_s15 = scalar_lea.hbm %s301_s0, 128 }
   0x5   :  { %p164_p0 = scmp.ne.s32.totalorder %s301_s0, %s163_s15  ;;  %p167_p1 = scmp.lt.u32.totalorder %s163_s15, %s301_s0 }
   0x7   :  { %p169_p2 = pnand %p167_p1, %p164_p0 }
   0x9   :  { %172 = shalt.err (!%p169_p2)
}
   0xa   :  { %s173_s20 = scalar_lea.vmem %s17_s10, 128  ;;  %p178_p4 = scmp.lt.s32.totalorder %s17_s10, %s17_s10 }
   0xb   :  { %p174_p3 = scmp.ne.s32.totalorder %s17_s10, %s173_s20  ;;  %p179_p5 = scmp.lt.s32.totalorder %s173_s20, %s173_s20 }
   0xd   :  { %p180_p6 = por %p179_p5, %p178_p4 }
   0xf   :  { %p181_p7 = pnand %p180_p6, %p174_p3 }
  0x11   :  { %184 = shalt.err (!%p181_p7)
}
  0x12   :  { %19 = dma.hbm_to_vmem [thread:$0]  %s301_s0, 128, %s17_s10, [#allocation3]  }
  0x13   :  { %s185_s25 = scalar_lea.hbm %s302_s1, 384 }
  0x14   :  { %p186_p8 = scmp.ne.s32.totalorder %s302_s1, %s185_s25  ;;  %p189_p9 = scmp.lt.u32.totalorder %s185_s25, %s302_s1 }
  0x16   :  { %p191_p10 = pnand %p189_p9, %p186_p8 }
  0x18   :  { %194 = shalt.err (!%p191_p10)
}
  0x19   :  { %s195_s30 = scalar_lea.vmem %s258_s12, 384  ;;  %p200_p12 = scmp.lt.s32.totalorder %s258_s12, %s258_s12 }
  0x1a   :  { %p196_p11 = scmp.ne.s32.totalorder %s258_s12, %s195_s30  ;;  %p201_p13 = scmp.lt.s32.totalorder %s195_s30, %s195_s30 }
  0x1c   :  { %p202_p0 = por %p201_p13, %p200_p12 }
  0x1e   :  { %p203_p1 = pnand %p202_p0, %p196_p11 }
  0x20   :  { %206 = shalt.err (!%p203_p1)
}
  0x21   :  { %s237_s0 = smov 128   ;;  %s238_s3 = smov 8  }
  0x22   :  { %31 = dma.hbm_to_vmem [thread:$0]  %s302_s1, 384, %s258_s12, [#allocation6], %s237_s0, %s237_s0, %s238_s3  }
  0x23   :  { %229 = dma.done.wait [#allocation3], 128  }
  0x24   :  { %230 = vsyncadd [#allocation3], 4294967168 }
  0x25   :  { %231 = dma.done.wait [#allocation6], 384  }
  0x26   :  { %232 = vsyncadd [#allocation6], 4294966912  ;;  %v239_v0 = vmov 0.0|0.0   ;;  %vm240_vm0 = vmmov 0   ;;  %v241_v1 = vmov 0.0   ;;  %v39_v2 = vld [vmem:[#allocation5] sm:$0xff] }
  0x27   :  { %152 = vmatprep.subr.bf16.mxu0 %v239_v0  ;;  %149 = vmatprep.mubr.msk.f32.mxu0 %vm240_vm0, %v241_v1  ;;  %v40_v3 = vld [vmem:[#allocation5 + $0x8] sm:$0xff]  ;;  %v41_v5 = vld [vmem:[#allocation5 + $0x10] sm:$0xf]  ;;  %vm46_vm1 = vcmask 1043456   ;;  %v38_v6 = vld [vmem:[#allocation2] sm:$0xff]  ;;  %vm42_vm2 = vcmask 162816  }
  0x28   :  { %v153_v4 = vpack.c.bf16 %v40_v3, %v39_v2  ;;  %s242_s1 = smov [#allocation7]  }
  0x29   :  { %s127_s6 = sshll.u32 %s242_s1, 4  ;;  %s128_s6 = int_to_ptr.vmem [resolvable:$true] %s127_s6 }
  0x2a   :  { %154 = vmatpush3.bf16.msra.mxu0 %v153_v4  ;;  %s207_s7 = scalar_lea.vmem %s128_s6, 128  ;;  %p212_p3 = scmp.lt.s32.totalorder %s128_s6, %s128_s6 }
  0x2b   :  { %147 = vmatprep.subr.mxu0 %v241_v1  ;;  %p208_p2 = scmp.ne.s32.totalorder %s128_s6, %s207_s7  ;;  %p213_p4 = scmp.lt.s32.totalorder %s207_s7, %s207_s7 }
  0x2d   :  { %p214_p5 = por %p213_p4, %p212_p3 }
  0x2e   :  { %148 = vmatpush3.msk.msra.mxu0 %vm46_vm1, %v41_v5 }
  0x2f   :  { %150 = vmatmul.mubr.msk.f32.vlgmr.msra.gmra.mrb[0].mxu0 %vm42_vm2, %v38_v6  ;;  %p215_p6 = pnand %p214_p5, %p208_p2 }
 0x102   :  { %v116_v7 = vpop.f32.mrb[0].mxu0 }
 0x103   :  { %120 = vst [vmem:[#allocation7] sm:$0xff] %v116_v7  ;;  %v151_v8 = vpop.f32.mrb[1].mxu0 }
 0x104   :  { %218 = shalt.err (!%p215_p6)
}
 0x105   :  { %s219_s10 = scalar_lea.hbm %s303_s2, 128 }
 0x106   :  { %p220_p7 = scmp.ne.s32.totalorder %s303_s2, %s219_s10  ;;  %p223_p8 = scmp.lt.u32.totalorder %s219_s10, %s303_s2 }
 0x108   :  { %p225_p9 = pnand %p223_p8, %p220_p7 }
 0x10a   :  { %228 = shalt.err (!%p225_p9)
}
 0x10b   :  { %130 = dma.vmem_to_hbm [thread:$0]  %s128_s6, 128, %s303_s2, [#allocation4]  }
 0x10c   :  { %233 = dma.done.wait [#allocation4], 128  }
 0x10d   :  { %234 = vsyncadd [#allocation4], 4294967168 }
 0x10e   :  { %134 = vsyncpa [#allocation3], 1 }
 0x10f   :  { %135 = vsyncpa [#allocation6], 1 }
 0x110   :  { %136 = vsyncpa [#allocation4], 1 }

</bundles_post_ra>
